<compile_context>
chip_gen: v6e
topology: v6e:2x2x1
jax: 0.10.0
libtpu: 0.0.40
codegen_flags: <defaults>
</compile_context>

<pallas_src>
import functools

import jax
import jax.numpy as jnp
from jax import lax
from jax.experimental import pallas as pl
from jax.experimental.pallas import tpu as pltpu

_LANES = 128
_SUBLANES = 8
_GRANULE = _SUBLANES * _LANES          # 1024 elements = one (8,128) f32 vreg


def _softplus(x):
    # Numerically stable softplus matching torch BCEWithLogits:
    #   softplus(x) = max(x, 0) + log1p(exp(-|x|))
    return jnp.maximum(x, 0.0) + jnp.log1p(jnp.exp(-jnp.abs(x)))


def _bce_pair_sum_kernel(real_ref, fake_ref, out_ref, *,
                         n_blocks, steps, block_rows, chunk_rows,
                         rows_valid, has_overhang, last_block_partial):
    """Per-split accumulation of sum(softplus(-real) + softplus(fake))."""
    s = pl.program_id(0)               # split axis (megacore-parallel on v7x)
    i = pl.program_id(1)               # reduction step within this split

    @pl.when(i == 0)
    def _():
        out_ref[...] = jnp.zeros_like(out_ref)

    block_index = s * steps + i

    def accumulate(masked):
        # Chunked inner loop: DMA tiles stay big (block_rows x 128) while the
        # elementwise working set stays at chunk_rows x 128 (~256 KiB f32 per
        # intermediate), keeping Mosaic's VMEM temporaries small.
        n_chunks = block_rows // chunk_rows
        row0 = block_index * block_rows

        def body(c, acc):
            off = pl.multiple_of(c * chunk_rows, chunk_rows)
            r = real_ref[pl.ds(off, chunk_rows), :].astype(jnp.float32)
            f = fake_ref[pl.ds(off, chunk_rows), :].astype(jnp.float32)
            #   BCE(x, 1) = softplus(-x);  BCE(x, 0) = softplus(x)
            sp = (jnp.maximum(-r, 0.0) + jnp.log1p(jnp.exp(-jnp.abs(r)))
                  + jnp.maximum(f, 0.0) + jnp.log1p(jnp.exp(-jnp.abs(f))))
            if masked:
                # Only the last (partial) block pays for the iota/where mask;
                # select (not multiply) discards NaN/garbage in the OOB rows.
                rid = lax.broadcasted_iota(jnp.int32, sp.shape, 0) + (row0 + off)
                sp = jnp.where(rid < rows_valid, sp, 0.0)
            # (chunk_rows,128) -> (8,128) fold: trailing dims match the vreg
            # tile, so this is pure per-vreg VPU adds.
            return acc + jnp.sum(
                sp.reshape(chunk_rows // _SUBLANES, _SUBLANES, _LANES), axis=0)

        acc = lax.fori_loop(0, n_chunks, body,
                            jnp.zeros((_SUBLANES, _LANES), jnp.float32))
        out_ref[...] += acc

    if not last_block_partial and not has_overhang:
        # Common fast path: every block is full and every grid step is real.
        accumulate(masked=False)
    else:
        last_real = n_blocks - 1
        if last_block_partial:
            steady_cond = block_index < last_real
        else:
            steady_cond = block_index < n_blocks

        @pl.when(steady_cond)
        def _():
            accumulate(masked=False)

        if last_block_partial:
            @pl.when(block_index == last_real)
            def _():
                accumulate(masked=True)
        # block_index >= n_blocks (overhang step of the 2-way split): the
        # index_map clamped its DMA to the last real block; contribute nothing.


def pix2pix_discriminator_loss(real_discriminated, fake_discriminated, *,
                               min_kernel_elements=131072,
                               max_block_rows=None,
                               chunk_rows=512):
    """Pallas implementation of Pix2PixDiscriminatorLoss.forward."""
    assert real_discriminated.shape == fake_discriminated.shape, (
        "kernel assumes real/fake logits have identical shape (standard pix2pix)")
    n = int(real_discriminated.size)
    assert n > 0

    r_flat = real_discriminated.reshape(-1)
    f_flat = fake_discriminated.reshape(-1)

    aligned_n = (n // _GRANULE) * _GRANULE

    # Small-n fallback: for typical patch-GAN outputs the whole problem is one
    # tile and kernel-launch / layout plumbing dominates — plain XLA wins.
    if n < min_kernel_elements or aligned_n == 0:
        r = r_flat.astype(jnp.float32)
        f = f_flat.astype(jnp.float32)
        return (jnp.mean(_softplus(-r)) + jnp.mean(_softplus(f))) * 0.5

    rows = aligned_n // _LANES                      # multiple of 8

    # Ragged tail (< 1024 elements): pure JAX, instead of a jnp.pad that would
    # read + write a full padded copy of each input (~3x HBM traffic).
    tail_sum = jnp.float32(0.0)
    if aligned_n != n:
        r_tail = r_flat[aligned_n:].astype(jnp.float32)
        f_tail = f_flat[aligned_n:].astype(jnp.float32)
        tail_sum = jnp.sum(_softplus(-r_tail)) + jnp.sum(_softplus(f_tail))

    # Lane-dense [rows, 128] slabs in the ORIGINAL dtype (bf16 stays bf16 on
    # the wire; the cast to f32 happens per-chunk in-kernel).
    r2 = r_flat[:aligned_n].reshape(rows, _LANES)
    f2 = f_flat[:aligned_n].reshape(rows, _LANES)

    itemsize = real_discriminated.dtype.itemsize
    if max_block_rows is None:
        # ~4 MiB per input DMA tile (8192 rows f32 / 16384 rows bf16).
        max_block_rows = (4 * 1024 * 1024) // (_LANES * itemsize)

    # Block/chunk geometry: block_rows <= rows, multiple of chunk_rows,
    # chunk_rows a multiple of 8 — so every block_shape dim is (8,128)-legal
    # and the in-kernel chunk loop has no ragged remainder.
    block_rows = min(max_block_rows, rows)
    chunk_rows = max(_SUBLANES,
                     (min(chunk_rows, block_rows) // _SUBLANES) * _SUBLANES)
    block_rows = max(chunk_rows, (block_rows // chunk_rows) * chunk_rows)

    n_blocks = -(-rows // block_rows)
    num_splits = 2 if n_blocks >= 2 else 1          # unconditional 2-TC split
    steps = -(-n_blocks // num_splits)
    has_overhang = (num_splits * steps) != n_blocks
    last_block_partial = (rows % block_rows) != 0

    if has_overhang:
        def block_index_map(s, i):
            # Clamp the overhang step so its DMA stays in bounds; the kernel
            # skips its accumulation.
            return (jnp.minimum(s * steps + i, n_blocks - 1), 0)
    else:
        def block_index_map(s, i):
            return (s * steps + i, 0)

    kernel = functools.partial(
        _bce_pair_sum_kernel,
        n_blocks=n_blocks, steps=steps, block_rows=block_rows,
        chunk_rows=chunk_rows, rows_valid=rows,
        has_overhang=has_overhang, last_block_partial=last_block_partial)

    in_spec = pl.BlockSpec((block_rows, _LANES), block_index_map)

    # 2 inputs x 2 pipeline buffers + headroom for chunk-sized temporaries;
    # raised explicitly so v5e's 16 MiB default doesn't OOM, and kept well
    # under v7x's 64 MiB physical VMEM.
    tile_bytes = block_rows * _LANES * itemsize
    vmem_limit = int(min(48 << 20, max(16 << 20, 4 * tile_bytes + (8 << 20))))

    partials = pl.pallas_call(
        kernel,
        out_shape=jax.ShapeDtypeStruct((num_splits, _SUBLANES, _LANES),
                                       jnp.float32),
        grid_spec=pltpu.PrefetchScalarGridSpec(
            num_scalar_prefetch=0,
            grid=(num_splits, steps),
            in_specs=[in_spec, in_spec],
            out_specs=pl.BlockSpec((None, _SUBLANES, _LANES),
                                   lambda s, i: (s, 0, 0)),
        ),
        compiler_params=pltpu.CompilerParams(
            dimension_semantics=("parallel", "arbitrary"),
            vmem_limit_bytes=vmem_limit),
    )(r2, f2)

    # Single final cross-lane reduce + normalization by 2*N.
    total = jnp.sum(partials) + tail_sum
    return total * (0.5 / n)


def _reference_loss(real, fake):
    """Pure-JAX reference mirroring torch BCEWithLogits semantics."""
    r = real.astype(jnp.float32).reshape(-1)
    f = fake.astype(jnp.float32).reshape(-1)
    return (jnp.mean(_softplus(-r)) + jnp.mean(_softplus(f))) * 0.5


if __name__ == "__main__":
    key = jax.random.PRNGKey(0)
    k1, k2, k3, k4, k5, k6 = jax.random.split(key, 6)

    # 1) Patch-GAN style logits, NCHW, f32 — force the Pallas path
    #    (min_kernel_elements=0) so the kernel itself is exercised.
    real1 = jax.random.normal(k1, (2, 4, 16, 16), dtype=jnp.float32) * 2.0
    fake1 = jax.random.normal(k2, (2, 4, 16, 16), dtype=jnp.float32) * 2.0
    out1 = jax.block_until_ready(
        pix2pix_discriminator_loss(real1, fake1, min_kernel_elements=0))
    ref1 = _reference_loss(real1, fake1)
    assert jnp.allclose(out1, ref1, rtol=1e-5, atol=1e-5), (out1, ref1)

    # 2) Ragged bf16 (n % 1024 != 0): aligned-prefix kernel + pure-JAX tail.
    real2 = (jax.random.normal(k3, (2, 1, 30, 30), dtype=jnp.float32) * 2.0
             ).astype(jnp.bfloat16)
    fake2 = (jax.random.normal(k4, (2, 1, 30, 30), dtype=jnp.float32) * 2.0
             ).astype(jnp.bfloat16)
    out2 = jax.block_until_ready(
        pix2pix_discriminator_loss(real2, fake2, min_kernel_elements=0))
    ref2 = _reference_loss(real2, fake2)
    assert jnp.allclose(out2, ref2, rtol=1e-5, atol=1e-5), (out2, ref2)

    # 3) Multi-block case with an odd block count: exercises the unconditional
    #    2-way split, the clamped overhang step and the chunked inner loop.
    real3 = jax.random.normal(k5, (3, 1, 128, 128), dtype=jnp.float32) * 2.0
    fake3 = jax.random.normal(k6, (3, 1, 128, 128), dtype=jnp.float32) * 2.0
    out3 = jax.block_until_ready(
        pix2pix_discriminator_loss(real3, fake3, min_kernel_elements=0,
                                   max_block_rows=128, chunk_rows=64))
    ref3 = _reference_loss(real3, fake3)
    assert jnp.allclose(out3, ref3, rtol=1e-5, atol=1e-5), (out3, ref3)

    # 4) Default config on a small input: pure-JAX fallback path.
    out4 = jax.block_until_ready(pix2pix_discriminator_loss(real1, fake1))
    assert jnp.allclose(out4, ref1, rtol=1e-5, atol=1e-5), (out4, ref1)

    print("KERNEL_OK")
</pallas_src>

<mosaic_0001>
module attributes {stable_mosaic.version = 11 : i64} {
  func.func @_bce_pair_sum_kernel(%arg0: i32, %arg1: i32, %arg2: memref<16x128xf32, #tpu.memory_space<vmem>>, %arg3: memref<16x128xf32, #tpu.memory_space<vmem>>, %arg4: memref<1x8x128xf32, #tpu.memory_space<vmem>>) attributes {dimension_semantics = [#tpu.dimension_semantics<parallel>, #tpu.dimension_semantics<arbitrary>], iteration_bounds = array<i64: 1, 1>, scalar_prefetch = 0 : i64, scratch_operands = 0 : i64, tpu.core_type = #tpu.core_type<tc>, window_params = [{transform_indices = @transform_0, window_bounds = array<i64: 16, 128>}, {transform_indices = @transform_1, window_bounds = array<i64: 16, 128>}, {transform_indices = @transform_2, window_bounds = array<i64: 1, 8, 128>}]} {
    %c0_i32 = arith.constant 0 : i32
    %0 = arith.cmpi eq, %arg1, %c0_i32 : i32
    %1 = arith.extui %0 : i1 to i32
    %c0_i32_0 = arith.constant 0 : i32
    %2 = arith.cmpi ne, %1, %c0_i32_0 : i32
    scf.if %2 {
      %cst_15 = arith.constant 0.000000e+00 : f32
      %38 = vector.broadcast %cst_15 : f32 to vector<8x128xf32>
      %c0_16 = arith.constant 0 : index
      %c0_17 = arith.constant 0 : index
      %c0_18 = arith.constant 0 : index
      %39 = vector.load %arg4[%c0_16, %c0_17, %c0_18] : memref<1x8x128xf32, #tpu.memory_space<vmem>>, vector<1x8x128xf32>
      %40 = vector.shape_cast %39 : vector<1x8x128xf32> to vector<8x128xf32>
      %41 = vector.shape_cast %38 : vector<8x128xf32> to vector<1x8x128xf32>
      tpu.vector_store %arg4[%c0_16, %c0_17, %c0_18], %41 {strides = array<i32>} : memref<1x8x128xf32, #tpu.memory_space<vmem>>, vector<1x8x128xf32>,
    } else {
    }
    %cst = arith.constant 0.000000e+00 : f32
    %3 = vector.broadcast %cst : f32 to vector<8x128xf32>
    %c0_i32_1 = arith.constant 0 : i32
    %c16_i32 = arith.constant 16 : i32
    %4 = arith.muli %c0_i32_1, %c16_i32 : i32
    %5 = tpu.assume_multiple %4, 16 : i32
    %6 = arith.index_cast %5 : i32 to index
    %c0 = arith.constant 0 : index
    %7 = vector.load %arg2[%6, %c0] : memref<16x128xf32, #tpu.memory_space<vmem>>, vector<16x128xf32>
    %8 = arith.index_cast %5 : i32 to index
    %c0_2 = arith.constant 0 : index
    %9 = vector.load %arg3[%8, %c0_2] : memref<16x128xf32, #tpu.memory_space<vmem>>, vector<16x128xf32>
    %cst_3 = arith.constant 0.000000e+00 : f32
    %10 = vector.broadcast %cst_3 : f32 to vector<16x128xf32>
    %11 = arith.subf %10, %7 : vector<16x128xf32>
    %cst_4 = arith.constant 0.000000e+00 : f32
    %12 = vector.broadcast %cst_4 : f32 to vector<16x128xf32>
    %13 = arith.maximumf %11, %12 : vector<16x128xf32>
    %14 = math.absf %7 : vector<16x128xf32>
    %cst_5 = arith.constant 0.000000e+00 : f32
    %15 = vector.broadcast %cst_5 : f32 to vector<16x128xf32>
    %16 = arith.subf %15, %14 : vector<16x128xf32>
    %17 = math.exp %16 : vector<16x128xf32>
    %18 = math.log1p %17 : vector<16x128xf32>
    %19 = arith.addf %13, %18 : vector<16x128xf32>
    %cst_6 = arith.constant 0.000000e+00 : f32
    %20 = vector.broadcast %cst_6 : f32 to vector<16x128xf32>
    %21 = arith.maximumf %9, %20 : vector<16x128xf32>
    %22 = arith.addf %19, %21 : vector<16x128xf32>
    %23 = math.absf %9 : vector<16x128xf32>
    %cst_7 = arith.constant 0.000000e+00 : f32
    %24 = vector.broadcast %cst_7 : f32 to vector<16x128xf32>
    %25 = arith.subf %24, %23 : vector<16x128xf32>
    %26 = math.exp %25 : vector<16x128xf32>
    %27 = math.log1p %26 : vector<16x128xf32>
    %28 = arith.addf %22, %27 : vector<16x128xf32>
    %29 = vector.shape_cast %28 : vector<16x128xf32> to vector<2x8x128xf32>
    %cst_8 = arith.constant dense<0.000000e+00> : vector<8x128xf32>
    %30 = vector.multi_reduction <add>, %29, %cst_8 [0] : vector<2x8x128xf32> to vector<8x128xf32>
    %31 = arith.addf %3, %30 : vector<8x128xf32>
    %c1_i32 = arith.constant 1 : i32
    %c0_9 = arith.constant 0 : index
    %c0_10 = arith.constant 0 : index
    %c0_11 = arith.constant 0 : index
    %32 = vector.load %arg4[%c0_9, %c0_10, %c0_11] : memref<1x8x128xf32, #tpu.memory_space<vmem>>, vector<1x8x128xf32>
    %33 = vector.shape_cast %32 : vector<1x8x128xf32> to vector<8x128xf32>
    %34 = arith.addf %33, %31 : vector<8x128xf32>
    %c0_12 = arith.constant 0 : index
    %c0_13 = arith.constant 0 : index
    %c0_14 = arith.constant 0 : index
    %35 = vector.load %arg4[%c0_12, %c0_13, %c0_14] : memref<1x8x128xf32, #tpu.memory_space<vmem>>, vector<1x8x128xf32>
    %36 = vector.shape_cast %35 : vector<1x8x128xf32> to vector<8x128xf32>
    %37 = vector.shape_cast %34 : vector<8x128xf32> to vector<1x8x128xf32>
    tpu.vector_store %arg4[%c0_12, %c0_13, %c0_14], %37 {strides = array<i32>} : memref<1x8x128xf32, #tpu.memory_space<vmem>>, vector<1x8x128xf32>,
    return
  }
  func.func @transform_0(%arg0: i32, %arg1: i32) -> (i32, i32) {
    %c1_i32 = arith.constant 1 : i32
    %0 = arith.muli %arg0, %c1_i32 : i32
    %1 = arith.addi %0, %arg1 : i32
    %c0_i32 = arith.constant 0 : i32
    %c0_i32_0 = arith.constant 0 : i32
    return %1, %c0_i32 : i32, i32
  }
  func.func @transform_1(%arg0: i32, %arg1: i32) -> (i32, i32) {
    %c1_i32 = arith.constant 1 : i32
    %0 = arith.muli %arg0, %c1_i32 : i32
    %1 = arith.addi %0, %arg1 : i32
    %c0_i32 = arith.constant 0 : i32
    %c0_i32_0 = arith.constant 0 : i32
    return %1, %c0_i32 : i32, i32
  }
  func.func @transform_2(%arg0: i32, %arg1: i32) -> (i32, i32, i32) {
    %c0_i32 = arith.constant 0 : i32
    %c0_i32_0 = arith.constant 0 : i32
    %c0_i32_1 = arith.constant 0 : i32
    return %arg0, %c0_i32, %c0_i32_0 : i32, i32, i32
  }
}

</mosaic_0001>

<bundles_post_ra>
// kernel: tpu_custom_call.1
= control target key start
LH: loop header
LB: loop body
LE: loop exit
PB: predicated region body
PF: predicated region fallthrough
CT: control target
= control target key end

     0   :  { %7 = vsyncpa [#allocation3], 0  ;;  %s277_s0 = inlined_call_operand.hbm [shape: f32[16,128], index: 0, kind: input, shape index: {}]   ;;  %s278_s1 = inlined_call_operand.hbm [shape: f32[16,128], index: 1, kind: input, shape index: {}]   ;;  %s279_s2 = inlined_call_operand.hbm [shape: f32[1,8,128], index: 2, kind: output, shape index: {}]  }
   0x1   :  { %8 = vsyncpa [#allocation6], 0 }
   0x2   :  { %9 = vsyncpa [#allocation4], 0  ;;  %s234_s9 = smov [#allocation2]  }
   0x3   :  { %s19_s10 = sshll.u32 %s234_s9, 4  ;;  %s20_s10 = int_to_ptr.vmem [resolvable:$true] %s19_s10 }
   0x4   :  { %s176_s11 = scalar_lea.vmem %s20_s10, 256  ;;  %p181_p1 = scmp.lt.s32.totalorder %s20_s10, %s20_s10 }
   0x5   :  { %p177_p0 = scmp.ne.s32.totalorder %s20_s10, %s176_s11  ;;  %p182_p2 = scmp.lt.s32.totalorder %s176_s11, %s176_s11 }
   0x7   :  { %p183_p3 = por %p182_p2, %p181_p1 }
   0x9   :  { %p184_p4 = pnand %p183_p3, %p177_p0 }
   0xb   :  { %187 = shalt.err (!%p184_p4)
}
   0xc   :  { %s235_s12 = smov 128   ;;  %s236_s13 = smov 8  }
   0xd   :  { %25 = dma.hbm_to_vmem [thread:$0]  %s277_s0, 256, %s20_s10, [#allocation3], %s235_s12, %s235_s12, %s236_s13  }
   0xe   :  { %s237_s16 = smov [#allocation5]  }
   0xf   :  { %s35_s17 = sshll.u32 %s237_s16, 4  ;;  %s36_s17 = int_to_ptr.vmem [resolvable:$true] %s35_s17 }
  0x10   :  { %s196_s18 = scalar_lea.vmem %s36_s17, 256  ;;  %p201_p6 = scmp.lt.s32.totalorder %s36_s17, %s36_s17 }
  0x11   :  { %p197_p5 = scmp.ne.s32.totalorder %s36_s17, %s196_s18  ;;  %p202_p7 = scmp.lt.s32.totalorder %s196_s18, %s196_s18 }
  0x13   :  { %p203_p8 = por %p202_p7, %p201_p6 }
  0x15   :  { %p204_p9 = pnand %p203_p8, %p197_p5 }
  0x17   :  { %207 = shalt.err (!%p204_p9)
}
  0x18   :  { %41 = dma.hbm_to_vmem [thread:$0]  %s278_s1, 256, %s36_s17, [#allocation6], %s235_s12, %s235_s12, %s236_s13  }
  0x19   :  { %228 = dma.done.wait [#allocation3], 256  }
  0x1a   :  { %229 = vsyncadd [#allocation3], 4294967040 }
  0x1b   :  { %230 = dma.done.wait [#allocation6], 256  }
  0x1c   :  { %231 = vsyncadd [#allocation6], 4294967040  ;;  %v57_v0 = vld [vmem:[#allocation2] sm:$0xff]  ;;  %v58_v1 = vld [vmem:[#allocation2 + $0x8] sm:$0xff]  ;;  %s238_s0 = smov [#allocation7]  }
  0x1d   :  { %v260_v2 = vld [vmem:[#allocation5] sm:$0xff]  ;;  %v262_v3 = vld [vmem:[#allocation5 + $0x8] sm:$0xff]  ;;  %v65_v4 = vand.u32 2147483647, %v57_v0  ;;  %v66_v5 = vand.u32 2147483647, %v58_v1 }
  0x1e   :  { %v97_v6 = vand.u32 2147483647, %v260_v2  ;;  %v98_v8 = vand.u32 2147483647, %v262_v3  ;;  %v61_v29 = vsub.f32 0.0, %v57_v0  ;;  %v62_v32 = vsub.f32 0.0, %v58_v1 }
  0x1f   :  { %v67_v7 = vsub.f32 0.0, %v65_v4  ;;  %v68_v9 = vsub.f32 0.0, %v66_v5  ;;  %v93_v49 = vmax.f32 %v260_v2, 0.0  ;;  %v94_v51 = vmax.f32 %v262_v3, 0.0  ;;  %s136_s1 = sshll.u32 %s238_s0, 4  ;;  %s137_s1 = int_to_ptr.vmem [resolvable:$true] %s136_s1 }
  0x20   :  { %v99_v10 = vsub.f32 0.0, %v97_v6  ;;  %v100_v12 = vsub.f32 0.0, %v98_v8  ;;  %v63_v39 = vmax.f32 %v61_v29, 0.0  ;;  %v64_v44 = vmax.f32 %v62_v32, 0.0  ;;  %s208_s21 = scalar_lea.vmem %s137_s1, 128  ;;  %p213_p11 = scmp.lt.s32.totalorder %s137_s1, %s137_s1 }
  0x21   :  { %v69_v11 = vmul.f32 1.442695, %v67_v7  ;;  %v71_v13 = vmul.f32 1.442695, %v68_v9  ;;  %p209_p10 = scmp.ne.s32.totalorder %s137_s1, %s208_s21  ;;  %p214_p12 = scmp.lt.s32.totalorder %s208_s21, %s208_s21 }
  0x22   :  { %v101_v14 = vmul.f32 1.442695, %v99_v10  ;;  %v103_v15 = vmul.f32 1.442695, %v100_v12 }
  0x23   :  { %152 = vpow2.f32 %v69_v11  ;;  %p215_p13 = por %p214_p12, %p213_p11 }
  0x24   :  { %154 = vpow2.f32 %v71_v13 }
  0x25   :  { %156 = vpow2.f32 %v101_v14  ;;  %p216_p0 = pnand %p215_p13, %p209_p10 }
  0x26   :  { %158 = vpow2.f32 %v103_v15 }
  0x30   :  { %v153_v16 = vpop.eup %152 }
  0x31   :  { %v155_v17 = vpop.eup %154  ;;  %v73_v18 = vadd.f32 1.0, %v153_v16  ;;  %v76_v24 = vmul.f32 -0.5, %v153_v16  ;;  %v79_v30 = vand.u32 2147483647, %v153_v16 }
  0x32   :  { %v157_v19 = vpop.eup %156  ;;  %v82_v20 = vadd.f32 1.0, %v155_v17  ;;  %v85_v25 = vmul.f32 -0.5, %v155_v17  ;;  %v88_v33 = vand.u32 2147483647, %v155_v17 }
  0x33   :  { %v159_v21 = vpop.eup %158  ;;  %160 = vlog2.f32 %v73_v18  ;;  %v105_v22 = vadd.f32 1.0, %v157_v19  ;;  %v108_v26 = vmul.f32 -0.5, %v157_v19  ;;  %v77_v27 = vadd.f32 1.0, %v76_v24 }
  0x34   :  { %162 = vlog2.f32 %v82_v20  ;;  %v114_v23 = vadd.f32 1.0, %v159_v21  ;;  %v117_v28 = vmul.f32 -0.5, %v159_v21  ;;  %v86_v31 = vadd.f32 1.0, %v85_v25 }
  0x35   :  { %164 = vlog2.f32 %v105_v22  ;;  %v109_v34 = vadd.f32 1.0, %v108_v26  ;;  %v111_v35 = vand.u32 2147483647, %v157_v19  ;;  %v78_v36 = vmul.f32 %v153_v16, %v77_v27 }
  0x36   :  { %166 = vlog2.f32 %v114_v23  ;;  %v118_v37 = vadd.f32 1.0, %v117_v28  ;;  %vm266_vm0 = vcmp.lt.f32.partialorder %v79_v30, 0.0004427343  ;;  %v87_v41 = vmul.f32 %v155_v17, %v86_v31 }
  0x37   :  { %v120_v42 = vand.u32 2147483647, %v159_v21  ;;  %vm89_vm1 = vcmp.lt.f32.partialorder %v88_v33, 0.0004427343  ;;  %v110_v46 = vmul.f32 %v157_v19, %v109_v34  ;;  %vm112_vm2 = vcmp.lt.f32.partialorder %v111_v35, 0.0004427343 }
  0x38   :  { %v119_v53 = vmul.f32 %v159_v21, %v118_v37 }
  0x39   :  { %vm121_vm3 = vcmp.lt.f32.partialorder %v120_v42, 0.0004427343 }
  0x40   :  { %v161_v38 = vpop.eup %160 }
  0x41   :  { %v163_v43 = vpop.eup %162  ;;  %v75_v45 = vmul.f32 0.6931472, %v161_v38 }
  0x42   :  { %v165_v47 = vpop.eup %164  ;;  %v84_v48 = vmul.f32 0.6931472, %v163_v43 }
  0x43   :  { %v81_v50 = vsel %vm266_vm0, %v78_v36, %v75_v45  ;;  %v107_v52 = vmul.f32 0.6931472, %v165_v47  ;;  %v167_v54 = vpop.eup %166 }
  0x44   :  { %v90_v55 = vsel %vm89_vm1, %v87_v41, %v84_v48  ;;  %v91_v56 = vadd.f32 %v81_v50, %v63_v39  ;;  %v116_v59 = vmul.f32 0.6931472, %v167_v54 }
  0x45   :  { %v92_v57 = vadd.f32 %v90_v55, %v64_v44  ;;  %v113_v58 = vsel %vm112_vm2, %v110_v46, %v107_v52 }
  0x46   :  { %v95_v60 = vadd.f32 %v93_v49, %v91_v56  ;;  %v122_v62 = vsel %vm121_vm3, %v119_v53, %v116_v59 }
  0x47   :  { %v96_v61 = vadd.f32 %v94_v51, %v92_v57 }
  0x48   :  { %v123_v63 = vadd.f32 %v113_v58, %v95_v60 }
  0x49   :  { %v124_v0 = vadd.f32 %v122_v62, %v96_v61 }
  0x4b   :  { %v125_v1 = vadd.f32 %v124_v0, %v123_v63 }
  0x4d   :  { %129 = vst [vmem:[#allocation7] sm:$0xff] %v125_v1 }
  0x4e   :  { %219 = shalt.err (!%p216_p0)
}
  0x4f   :  { %139 = dma.vmem_to_hbm [thread:$0]  %s137_s1, 128, %s279_s2, [#allocation4]  }
  0x50   :  { %232 = dma.done.wait [#allocation4], 128  }
  0x51   :  { %233 = vsyncadd [#allocation4], 4294967168 }
  0x52   :  { %143 = vsyncpa [#allocation3], 1 }
  0x53   :  { %144 = vsyncpa [#allocation6], 1 }
  0x54   :  { %145 = vsyncpa [#allocation4], 1 }

</bundles_post_ra>
